<compile_context>
chip_gen: v7x
topology: tpu7x:2x2x1
jax: 0.10.0
libtpu: 0.0.40
codegen_flags: <defaults>
</compile_context>

<pallas_src>
import jax
import jax.numpy as jnp
import numpy as np
from jax.experimental import pallas as pl
from jax.experimental.pallas import tpu as pltpu  # noqa: F401  (TPU backend)


# ------------------------------- kernel -------------------------------------

def _residual_kernel(x_ref, vec_ref, shift_ref, w1_ref, w2_ref, wf_ref, bf_ref,
                     out_ref):
    """Fused Residual forward on lane-dense (H, N*W*C) tiles, single grid step.

    vec_ref rows : 0 = BN1 scale, 1 = BN1 shift,
                   2 = folded bias before ReLU2, 3 = folded bias before ReLU3
                   (per-lane, channel-fastest layout).
    shift_ref    : (2, H, H) row-shift matrices for the dy = -1 / +1 taps of
                   the 3x3 conv (zero rows at image borders -> 'same' pad in y).
    w1_ref       : (Lin, Lmid)      1x1 conv, BN2 scale folded into columns.
    w2_ref       : (3*Lmid, Lmid)   3x3 conv, dy blocks stacked along K; dx
                                    taps + x zero-padding are block-banded in,
                                    BN3 scale folded into columns.
    wf_ref       : (Lmid+Lin, Lout) [cbr3 1x1 ; skip 1x1] stacked along K.
    bf_ref       : (1, Lout)        merged cbr3 + skip bias.
    """
    Lin = x_ref.shape[1]
    Lmid = w1_ref.shape[1]

    x = x_ref[...]                                                  # (H, Lin)

    # cbr1: BN -> ReLU -> 1x1 conv (BN2 pre-activation constant-folded in)
    a1 = jnp.maximum(x * vec_ref[0:1, :Lin] + vec_ref[1:2, :Lin], 0.0)
    a2 = jnp.maximum(
        jnp.dot(a1, w1_ref[...], preferred_element_type=jnp.float32)
        + vec_ref[2:3, :Lmid], 0.0)                                 # (H, Lmid)

    # cbr2: 3x3 conv, pad=1.  dy taps via constant row-shift matmuls (MXU has
    # plenty of slack); dx taps + x padding live inside the banded weight, so
    # the whole 3x3 collapses into a single K = 3*Lmid dot.
    up = jnp.dot(shift_ref[0], a2, preferred_element_type=jnp.float32)  # a2[y-1]
    dn = jnp.dot(shift_ref[1], a2, preferred_element_type=jnp.float32)  # a2[y+1]
    a3 = jnp.maximum(
        jnp.dot(jnp.concatenate([up, a2, dn], axis=-1), w2_ref[...],
                preferred_element_type=jnp.float32)
        + vec_ref[3:4, :Lmid], 0.0)                                 # (H, Lmid)

    # cbr3 1x1 + skip 1x1 fused into one K = Lmid + Lin matmul, merged bias.
    out = jnp.dot(jnp.concatenate([a3, x], axis=-1), wf_ref[...],
                  preferred_element_type=jnp.float32) + bf_ref[...]
    out_ref[...] = out.astype(out_ref.dtype)                        # (H, Lout)


# ---------------------- wrapper-side weight preparation ----------------------

def _tile_lane(v, reps):
    # (1, C) per-channel vector -> (1, reps*C) lane pattern [c0..cC-1] * reps
    return jnp.tile(v.astype(jnp.float32), (1, reps))


def _block_diag_1x1(w, reps):
    # (Cin, Cout) -> (reps*Cin, reps*Cout) block-diagonal "big" 1x1-conv weight
    return jnp.kron(jnp.eye(reps, dtype=jnp.float32), w.astype(jnp.float32))


def _banded_3x3(w2, N, W):
    # (3, 3, Ch, Ch) -> (3, N*W*Ch, N*W*Ch).  Index 0 is dy; the three dx taps
    # and the x-direction zero padding are folded into a block-banded matrix
    # per W block; block-diagonal over N so batches never mix.
    ch_i, ch_o = w2.shape[2], w2.shape[3]
    eye_n = jnp.eye(N, dtype=jnp.float32)
    mats = []
    for dy in range(3):
        m = jnp.zeros((W * ch_i, W * ch_o), jnp.float32)
        for dx in range(3):
            m = m + jnp.kron(jnp.eye(W, k=1 - dx, dtype=jnp.float32),
                             w2[dy, dx].astype(jnp.float32))
        mats.append(jnp.kron(eye_n, m))
    return jnp.stack(mats)


def residual_forward(x_nchw, p):
    N, Cin, H, W = x_nchw.shape
    Ch = p["w1"].shape[-1]
    Cout = p["w3"].shape[-1]
    R = N * W                                   # lane replication factor
    Lin, Lmid, Lout = R * Cin, R * Ch, R * Cout

    # Lane-dense input: (H, N*W*Cin), lane = (n*W + w)*Cin + c  -> (16, 128)
    xd = jnp.transpose(x_nchw.astype(jnp.float32), (2, 0, 3, 1)).reshape(H, Lin)

    # Per-lane BN scale/shift & bias vectors.
    s1 = _tile_lane(p["s1"], R); t1 = _tile_lane(p["t1"], R)
    s2 = _tile_lane(p["s2"], R); t2 = _tile_lane(p["t2"], R)
    s3 = _tile_lane(p["s3"], R); t3 = _tile_lane(p["t3"], R)
    b1 = _tile_lane(p["b1"], R); b2 = _tile_lane(p["b2"], R)
    b3 = _tile_lane(p["b3"], R); bs = _tile_lane(p["bs"], R)

    # cbr1 weight with BN2 scale folded into its columns; b1 folded into BN2 shift.
    w1b = _block_diag_1x1(p["w1"], R) * s2                  # (Lin, Lmid)
    t2p = b1 * s2 + t2                                      # (1, Lmid)

    # cbr2 banded 3x3 weights with BN3 scale folded in; b2 folded into BN3 shift.
    w2b = (_banded_3x3(p["w2"], N, W) * s3).reshape(3 * Lmid, Lmid)
    t3p = b2 * s3 + t3                                      # (1, Lmid)

    # cbr3 1x1 + skip 1x1 fused: stacked weight + single merged bias.
    wfb = jnp.concatenate([_block_diag_1x1(p["w3"], R),
                           _block_diag_1x1(p["ws"], R)], axis=0)   # (Lmid+Lin, Lout)
    bfb = b3 + bs                                                  # (1, Lout)

    # Pack the four per-lane vectors into one small operand.
    Lmax = max(Lin, Lmid)
    vecs = jnp.zeros((4, Lmax), jnp.float32)
    vecs = vecs.at[0, :Lin].set(s1[0]).at[1, :Lin].set(t1[0])
    vecs = vecs.at[2, :Lmid].set(t2p[0]).at[3, :Lmid].set(t3p[0])

    # dy row-shift matrices (no wraparound -> y zero-padding is built in).
    shifts = jnp.stack([jnp.eye(H, k=-1, dtype=jnp.float32),   # row y <- y-1
                        jnp.eye(H, k=+1, dtype=jnp.float32)])  # row y <- y+1

    # Single grid step; default whole-array BlockSpecs place every operand in
    # VMEM once (total resident ~0.6 MiB), no per-step pipelining overhead.
    out = pl.pallas_call(
        _residual_kernel,
        out_shape=jax.ShapeDtypeStruct((H, Lout), jnp.float32),
    )(xd, vecs, shifts, w1b, w2b, wfb, bfb)

    # (H, N*W*Cout) -> NCHW
    return jnp.transpose(out.reshape(H, N, W, Cout), (1, 3, 0, 2))


# --------------------- parameters & pure-JAX reference ----------------------

def init_params(key, cin, cout, eps=1e-5):
    ch = cout // 2
    ks = jax.random.split(key, 20)

    def bn(kg, kb, km, kv, c):
        gamma = 1.0 + 0.1 * jax.random.normal(kg, (1, c), jnp.float32)
        beta = 0.1 * jax.random.normal(kb, (1, c), jnp.float32)
        mean = 0.1 * jax.random.normal(km, (1, c), jnp.float32)
        var = jax.random.uniform(kv, (1, c), jnp.float32, 0.5, 1.5)
        scale = gamma / jnp.sqrt(var + eps)
        shift = beta - mean * scale
        return scale, shift

    s1, t1 = bn(ks[0], ks[1], ks[2], ks[3], cin)
    s2, t2 = bn(ks[4], ks[5], ks[6], ks[7], ch)
    s3, t3 = bn(ks[8], ks[9], ks[10], ks[11], ch)
    p = dict(s1=s1, t1=t1, s2=s2, t2=t2, s3=s3, t3=t3)
    p["w1"] = 0.1 * jax.random.normal(ks[12], (cin, ch), jnp.float32)
    p["b1"] = 0.1 * jax.random.normal(ks[13], (1, ch), jnp.float32)
    p["w2"] = 0.1 * jax.random.normal(ks[14], (3, 3, ch, ch), jnp.float32)
    p["b2"] = 0.1 * jax.random.normal(ks[15], (1, ch), jnp.float32)
    p["w3"] = 0.1 * jax.random.normal(ks[16], (ch, cout), jnp.float32)
    p["b3"] = 0.1 * jax.random.normal(ks[17], (1, cout), jnp.float32)
    p["ws"] = 0.1 * jax.random.normal(ks[18], (cin, cout), jnp.float32)
    p["bs"] = 0.1 * jax.random.normal(ks[19], (1, cout), jnp.float32)
    return p


def reference_forward(x_nchw, p):
    x = jnp.transpose(x_nchw, (0, 2, 3, 1)).astype(jnp.float32)

    def conv(y, w_hwio, b, pad):
        return jax.lax.conv_general_dilated(
            y, w_hwio, (1, 1), [(pad, pad), (pad, pad)],
            dimension_numbers=("NHWC", "HWIO", "NHWC"),
            precision=jax.lax.Precision.HIGHEST) + b

    h = jnp.maximum(x * p["s1"] + p["t1"], 0.0)
    h = conv(h, p["w1"][None, None], p["b1"], 0)
    h = jnp.maximum(h * p["s2"] + p["t2"], 0.0)
    h = conv(h, p["w2"], p["b2"], 1)
    h = jnp.maximum(h * p["s3"] + p["t3"], 0.0)
    h = conv(h, p["w3"][None, None], p["b3"], 0)
    sk = conv(x, p["ws"][None, None], p["bs"], 0)
    return jnp.transpose(h + sk, (0, 3, 1, 2))


if __name__ == "__main__":
    key = jax.random.PRNGKey(0)
    kx, kp = jax.random.split(key)
    N, Cin, H, W = 2, 4, 16, 16
    Cout = 8   # inChannels != outChannels -> skip layer has a 1x1 conv

    x = jax.random.normal(kx, (N, Cin, H, W), jnp.float32)
    params = init_params(kp, Cin, Cout)

    out = residual_forward(x, params)
    out = jax.block_until_ready(out)

    ref = reference_forward(x, params)
    np.testing.assert_allclose(np.asarray(out), np.asarray(ref),
                               rtol=1e-4, atol=1e-4)
    print("KERNEL_OK")
</pallas_src>

<mosaic_0001>
module attributes {stable_mosaic.version = 11 : i64} {
  func.func @_residual_kernel(%arg0: memref<16x128xf32, #tpu.memory_space<vmem>>, %arg1: memref<4x128xf32, #tpu.memory_space<vmem>>, %arg2: memref<2x16x16xf32, #tpu.memory_space<vmem>>, %arg3: memref<128x128xf32, #tpu.memory_space<vmem>>, %arg4: memref<384x128xf32, #tpu.memory_space<vmem>>, %arg5: memref<256x256xf32, #tpu.memory_space<vmem>>, %arg6: memref<1x256xf32, #tpu.memory_space<vmem>>, %arg7: memref<16x256xf32, #tpu.memory_space<vmem>>) attributes {dimension_semantics = [], scalar_prefetch = 0 : i64, scratch_operands = 0 : i64, tpu.core_type = #tpu.core_type<tc>} {
    %c0 = arith.constant 0 : index
    %c0_0 = arith.constant 0 : index
    %0 = vector.load %arg0[%c0, %c0_0] : memref<16x128xf32, #tpu.memory_space<vmem>>, vector<16x128xf32>
    %c0_1 = arith.constant 0 : index
    %c0_2 = arith.constant 0 : index
    %1 = vector.load %arg1[%c0_1, %c0_2] : memref<4x128xf32, #tpu.memory_space<vmem>>, vector<1x128xf32>
    %2 = vector.broadcast %1 : vector<1x128xf32> to vector<16x128xf32>
    %3 = arith.mulf %0, %2 : vector<16x128xf32>
    %c1 = arith.constant 1 : index
    %c0_3 = arith.constant 0 : index
    %4 = vector.load %arg1[%c1, %c0_3] : memref<4x128xf32, #tpu.memory_space<vmem>>, vector<1x128xf32>
    %5 = vector.broadcast %4 : vector<1x128xf32> to vector<16x128xf32>
    %6 = arith.addf %3, %5 : vector<16x128xf32>
    %cst = arith.constant 0.000000e+00 : f32
    %7 = vector.broadcast %cst : f32 to vector<16x128xf32>
    %8 = arith.maximumf %6, %7 : vector<16x128xf32>
    %c0_4 = arith.constant 0 : index
    %c0_5 = arith.constant 0 : index
    %9 = vector.load %arg3[%c0_4, %c0_5] : memref<128x128xf32, #tpu.memory_space<vmem>>, vector<128x128xf32>
    %cst_6 = arith.constant dense<0.000000e+00> : vector<16x128xf32>
    %10 = tpu.matmul %8, %9, %cst_6 {dimension_numbers = #tpu.dot_dimension_numbers<[1], [0], [0], [1], [0, 0, 1, 1], [], []>} : vector<16x128xf32>, vector<128x128xf32>, vector<16x128xf32> -> vector<16x128xf32>
    %c2 = arith.constant 2 : index
    %c0_7 = arith.constant 0 : index
    %11 = vector.load %arg1[%c2, %c0_7] : memref<4x128xf32, #tpu.memory_space<vmem>>, vector<1x128xf32>
    %12 = vector.broadcast %11 : vector<1x128xf32> to vector<16x128xf32>
    %13 = arith.addf %10, %12 : vector<16x128xf32>
    %cst_8 = arith.constant 0.000000e+00 : f32
    %14 = vector.broadcast %cst_8 : f32 to vector<16x128xf32>
    %15 = arith.maximumf %13, %14 : vector<16x128xf32>
    %c0_9 = arith.constant 0 : index
    %c0_10 = arith.constant 0 : index
    %c0_11 = arith.constant 0 : index
    %16 = vector.load %arg2[%c0_9, %c0_10, %c0_11] : memref<2x16x16xf32, #tpu.memory_space<vmem>>, vector<1x16x16xf32>
    %17 = vector.shape_cast %16 : vector<1x16x16xf32> to vector<16x16xf32>
    %cst_12 = arith.constant dense<0.000000e+00> : vector<16x128xf32>
    %18 = tpu.matmul %17, %15, %cst_12 {dimension_numbers = #tpu.dot_dimension_numbers<[1], [0], [0], [1], [0, 0, 1, 1], [], []>} : vector<16x16xf32>, vector<16x128xf32>, vector<16x128xf32> -> vector<16x128xf32>
    %c1_13 = arith.constant 1 : index
    %c0_14 = arith.constant 0 : index
    %c0_15 = arith.constant 0 : index
    %19 = vector.load %arg2[%c1_13, %c0_14, %c0_15] : memref<2x16x16xf32, #tpu.memory_space<vmem>>, vector<1x16x16xf32>
    %20 = vector.shape_cast %19 : vector<1x16x16xf32> to vector<16x16xf32>
    %cst_16 = arith.constant dense<0.000000e+00> : vector<16x128xf32>
    %21 = tpu.matmul %20, %15, %cst_16 {dimension_numbers = #tpu.dot_dimension_numbers<[1], [0], [0], [1], [0, 0, 1, 1], [], []>} : vector<16x16xf32>, vector<16x128xf32>, vector<16x128xf32> -> vector<16x128xf32>
    %22 = tpu.concatenate %18, %15, %21 in 1 : vector<16x128xf32>, vector<16x128xf32>, vector<16x128xf32> -> vector<16x384xf32>
    %c0_17 = arith.constant 0 : index
    %c0_18 = arith.constant 0 : index
    %23 = vector.load %arg4[%c0_17, %c0_18] : memref<384x128xf32, #tpu.memory_space<vmem>>, vector<384x128xf32>
    %cst_19 = arith.constant dense<0.000000e+00> : vector<16x128xf32>
    %24 = tpu.matmul %22, %23, %cst_19 {dimension_numbers = #tpu.dot_dimension_numbers<[1], [0], [0], [1], [0, 0, 1, 1], [], []>} : vector<16x384xf32>, vector<384x128xf32>, vector<16x128xf32> -> vector<16x128xf32>
    %c3 = arith.constant 3 : index
    %c0_20 = arith.constant 0 : index
    %25 = vector.load %arg1[%c3, %c0_20] : memref<4x128xf32, #tpu.memory_space<vmem>>, vector<1x128xf32>
    %26 = vector.broadcast %25 : vector<1x128xf32> to vector<16x128xf32>
    %27 = arith.addf %24, %26 : vector<16x128xf32>
    %cst_21 = arith.constant 0.000000e+00 : f32
    %28 = vector.broadcast %cst_21 : f32 to vector<16x128xf32>
    %29 = arith.maximumf %27, %28 : vector<16x128xf32>
    %30 = tpu.concatenate %29, %0 in 1 : vector<16x128xf32>, vector<16x128xf32> -> vector<16x256xf32>
    %c0_22 = arith.constant 0 : index
    %c0_23 = arith.constant 0 : index
    %31 = vector.load %arg5[%c0_22, %c0_23] : memref<256x256xf32, #tpu.memory_space<vmem>>, vector<256x256xf32>
    %cst_24 = arith.constant dense<0.000000e+00> : vector<16x256xf32>
    %32 = tpu.matmul %30, %31, %cst_24 {dimension_numbers = #tpu.dot_dimension_numbers<[1], [0], [0], [1], [0, 0, 1, 1], [], []>} : vector<16x256xf32>, vector<256x256xf32>, vector<16x256xf32> -> vector<16x256xf32>
    %c0_25 = arith.constant 0 : index
    %c0_26 = arith.constant 0 : index
    %33 = vector.load %arg6[%c0_25, %c0_26] : memref<1x256xf32, #tpu.memory_space<vmem>>, vector<1x256xf32>
    %34 = vector.broadcast %33 : vector<1x256xf32> to vector<16x256xf32>
    %35 = arith.addf %32, %34 : vector<16x256xf32>
    %c0_27 = arith.constant 0 : index
    %c0_28 = arith.constant 0 : index
    %36 = vector.load %arg7[%c0_27, %c0_28] : memref<16x256xf32, #tpu.memory_space<vmem>>, vector<16x256xf32>
    tpu.vector_store %arg7[%c0_27, %c0_28], %35 {strides = array<i32>} : memref<16x256xf32, #tpu.memory_space<vmem>>, vector<16x256xf32>,
    return
  }
}

</mosaic_0001>

<bundles_post_ra>
// kernel: tpu_custom_call.1
= control target key start
LH: loop header
LB: loop body
LE: loop exit
PB: predicated region body
PF: predicated region fallthrough
CT: control target
= control target key end

     0   :  { %12 = vsyncpa [#allocation3], 0  ;;  %s1469_s0 = inlined_call_operand.hbm [shape: f32[16,128], index: 0, kind: input, shape index: {}]   ;;  %s1470_s1 = inlined_call_operand.hbm [shape: f32[4,128], index: 1, kind: input, shape index: {}]   ;;  %s1471_s2 = inlined_call_operand.hbm [shape: f32[2,16,16], index: 2, kind: input, shape index: {}]   ;;  %s1472_s3 = inlined_call_operand.hbm [shape: f32[128,128], index: 3, kind: input, shape index: {}]   ;;  %s1473_s4 = inlined_call_operand.hbm [shape: f32[384,128], index: 4, kind: input, shape index: {}]   ;;  %s1474_s5 = inlined_call_operand.hbm [shape: f32[256,256], index: 5, kind: input, shape index: {}]   ;;  %s1475_s6 = inlined_call_operand.vmem [shape: f32[1,256], index: 6, kind: input, shape index: {}]   ;;  %s1476_s7 = inlined_call_operand.hbm [shape: f32[16,256], index: 7, kind: output, shape index: {}]  }
   0x1   :  { %13 = vsyncpa [#allocation6], 0 }
   0x2   :  { %14 = vsyncpa [#allocation9], 0 }
   0x3   :  { %15 = vsyncpa [#allocation12], 0 }
   0x4   :  { %16 = vsyncpa [#allocation4], 0  ;;  %s1290_s24 = smov [#allocation5]   ;;  %s1126_s28 = scalar_lea.hbm %s1470_s1, 64 }
   0x5   :  { %s35_s25 = sshll.u32 %s1290_s24, 4  ;;  %p1127_p0 = scmp.ne.s32.totalorder %s1470_s1, %s1126_s28  ;;  %s36_s25 = int_to_ptr.vmem [resolvable:$true] %s35_s25 }
   0x6   :  { %p1130_p1 = scmp.lt.u32.totalorder %s1126_s28, %s1470_s1 }
   0x8   :  { %p1132_p2 = pnand %p1130_p1, %p1127_p0 }
   0xa   :  { %1135 = shalt.err (!%p1132_p2)
}
   0xb   :  { %s1136_s10 = scalar_lea.vmem %s36_s25, 64  ;;  %p1141_p4 = scmp.lt.s32.totalorder %s36_s25, %s36_s25 }
   0xc   :  { %p1137_p3 = scmp.ne.s32.totalorder %s36_s25, %s1136_s10  ;;  %p1142_p5 = scmp.lt.s32.totalorder %s1136_s10, %s1136_s10 }
   0xe   :  { %p1143_p6 = por %p1142_p5, %p1141_p4 }
  0x10   :  { %p1144_p7 = pnand %p1143_p6, %p1137_p3 }
  0x12   :  { %1147 = shalt.err (!%p1144_p7)
}
  0x13   :  { %38 = dma.hbm_to_vmem [thread:$0]  %s1470_s1, 64, %s36_s25, [#allocation6]  }
  0x14   :  { %s1291_s13 = smov [#allocation8]   ;;  %s1292_s15 = smov [#allocation2]  }
  0x15   :  { %s56_s14 = sshll.u32 %s1291_s13, 4  ;;  %s22_s16 = sshll.u32 %s1292_s15, 4  ;;  %s57_s14 = int_to_ptr.vmem [resolvable:$true] %s56_s14  ;;  %s23_s16 = int_to_ptr.vmem [resolvable:$true] %s22_s16 }
  0x16   :  { %s1148_s19 = scalar_lea.hbm %s1472_s3, 2048 }
  0x17   :  { %p1149_p8 = scmp.ne.s32.totalorder %s1472_s3, %s1148_s19  ;;  %p1152_p9 = scmp.lt.u32.totalorder %s1148_s19, %s1472_s3 }
  0x19   :  { %p1154_p10 = pnand %p1152_p9, %p1149_p8 }
  0x1b   :  { %1157 = shalt.err (!%p1154_p10)
}
  0x1c   :  { %s1158_s1 = scalar_lea.vmem %s57_s14, 2048  ;;  %p1163_p12 = scmp.lt.s32.totalorder %s57_s14, %s57_s14 }
  0x1d   :  { %p1159_p11 = scmp.ne.s32.totalorder %s57_s14, %s1158_s1  ;;  %p1164_p13 = scmp.lt.s32.totalorder %s1158_s1, %s1158_s1 }
  0x1f   :  { %p1165_p0 = por %p1164_p13, %p1163_p12 }
  0x21   :  { %p1166_p1 = pnand %p1165_p0, %p1159_p11 }
  0x23   :  { %1169 = shalt.err (!%p1166_p1)
}
  0x24   :  { %s1293_s24 = smov 128   ;;  %s1294_s25 = smov 8  }
  0x25   :  { %62 = dma.hbm_to_vmem [thread:$0]  %s1472_s3, 2048, %s57_s14, [#allocation9], %s1293_s24, %s1293_s24, %s1294_s25  }
  0x26   :  { %s1170_s30 = scalar_lea.hbm %s1469_s0, 256 }
  0x27   :  { %p1171_p2 = scmp.ne.s32.totalorder %s1469_s0, %s1170_s30  ;;  %p1174_p3 = scmp.lt.u32.totalorder %s1170_s30, %s1469_s0 }
  0x29   :  { %p1176_p4 = pnand %p1174_p3, %p1171_p2 }
  0x2b   :  { %1179 = shalt.err (!%p1176_p4)
}
  0x2c   :  { %s1180_s12 = scalar_lea.vmem %s23_s16, 256  ;;  %p1185_p6 = scmp.lt.s32.totalorder %s23_s16, %s23_s16 }
  0x2d   :  { %p1181_p5 = scmp.ne.s32.totalorder %s23_s16, %s1180_s12  ;;  %p1186_p7 = scmp.lt.s32.totalorder %s1180_s12, %s1180_s12 }
  0x2f   :  { %p1187_p8 = por %p1186_p7, %p1185_p6 }
  0x31   :  { %p1188_p9 = pnand %p1187_p8, %p1181_p5 }
  0x33   :  { %1191 = shalt.err (!%p1188_p9)
}
  0x34   :  { %28 = dma.hbm_to_vmem [thread:$0]  %s1469_s0, 256, %s23_s16, [#allocation3], %s1293_s24, %s1293_s24, %s1294_s25  }
  0x35   :  { %s1295_s14 = smov [#allocation7]   ;;  %s1296_s17 = smov [#allocation10]  }
  0x36   :  { %s44_s15 = sshll.u32 %s1295_s14, 4  ;;  %s68_s18 = sshll.u32 %s1296_s17, 4  ;;  %s45_s15 = int_to_ptr.vmem [resolvable:$true] %s44_s15  ;;  %s69_s18 = int_to_ptr.vmem [resolvable:$true] %s68_s18 }
  0x37   :  { %s1192_s21 = scalar_lea.hbm %s1471_s2, 512 }
  0x38   :  { %p1193_p10 = scmp.ne.s32.totalorder %s1471_s2, %s1192_s21  ;;  %p1196_p11 = scmp.lt.u32.totalorder %s1192_s21, %s1471_s2 }
  0x3a   :  { %p1198_p12 = pnand %p1196_p11, %p1193_p10 }
  0x3c   :  { %1201 = shalt.err (!%p1198_p12)
}
  0x3d   :  { %s1202_s0 = scalar_lea.vmem %s45_s15, 512  ;;  %p1207_p0 = scmp.lt.s32.totalorder %s45_s15, %s45_s15 }
  0x3e   :  { %p1203_p13 = scmp.ne.s32.totalorder %s45_s15, %s1202_s0  ;;  %p1208_p1 = scmp.lt.s32.totalorder %s1202_s0, %s1202_s0 }
  0x40   :  { %p1209_p2 = por %p1208_p1, %p1207_p0 }
  0x42   :  { %p1210_p3 = pnand %p1209_p2, %p1203_p13 }
  0x44   :  { %1213 = shalt.err (!%p1210_p3)
}
  0x45   :  { %50 = dma.hbm_to_vmem [thread:$0]  %s1471_s2, 512, %s45_s15, [#allocation6], %s1293_s24, %s1293_s24, %s1294_s25  }
  0x46   :  { %s1214_s30 = scalar_lea.hbm %s1473_s4, 6144 }
  0x47   :  { %p1215_p4 = scmp.ne.s32.totalorder %s1473_s4, %s1214_s30  ;;  %p1218_p5 = scmp.lt.u32.totalorder %s1214_s30, %s1473_s4 }
  0x49   :  { %p1220_p6 = pnand %p1218_p5, %p1215_p4 }
  0x4b   :  { %1223 = shalt.err (!%p1220_p6)
}
  0x4c   :  { %s1224_s12 = scalar_lea.vmem %s69_s18, 6144  ;;  %p1229_p8 = scmp.lt.s32.totalorder %s69_s18, %s69_s18 }
  0x4d   :  { %p1225_p7 = scmp.ne.s32.totalorder %s69_s18, %s1224_s12  ;;  %p1230_p9 = scmp.lt.s32.totalorder %s1224_s12, %s1224_s12 }
  0x4f   :  { %p1231_p10 = por %p1230_p9, %p1229_p8 }
  0x51   :  { %p1232_p11 = pnand %p1231_p10, %p1225_p7 }
  0x53   :  { %1235 = shalt.err (!%p1232_p11)
}
  0x54   :  { %74 = dma.hbm_to_vmem [thread:$0]  %s1473_s4, 6144, %s69_s18, [#allocation9], %s1293_s24, %s1293_s24, %s1294_s25  }
  0x55   :  { %s1297_s13 = smov [#allocation11]   ;;  %s1236_s19 = scalar_lea.hbm %s1474_s5, 8192 }
  0x56   :  { %s80_s14 = sshll.u32 %s1297_s13, 4  ;;  %p1237_p12 = scmp.ne.s32.totalorder %s1474_s5, %s1236_s19  ;;  %s81_s14 = int_to_ptr.vmem [resolvable:$true] %s80_s14 }
  0x57   :  { %p1240_p13 = scmp.lt.u32.totalorder %s1236_s19, %s1474_s5 }
  0x59   :  { %p1242_p0 = pnand %p1240_p13, %p1237_p12 }
  0x5b   :  { %1245 = shalt.err (!%p1242_p0)
}
  0x5c   :  { %s1246_s1 = scalar_lea.vmem %s81_s14, 8192  ;;  %p1251_p2 = scmp.lt.s32.totalorder %s81_s14, %s81_s14 }
  0x5d   :  { %p1247_p1 = scmp.ne.s32.totalorder %s81_s14, %s1246_s1  ;;  %p1252_p3 = scmp.lt.s32.totalorder %s1246_s1, %s1246_s1 }
  0x5f   :  { %p1253_p4 = por %p1252_p3, %p1251_p2 }
  0x61   :  { %p1254_p5 = pnand %p1253_p4, %p1247_p1 }
  0x63   :  { %1257 = shalt.err (!%p1254_p5)
}
  0x64   :  { %s1298_s4 = smov 256   ;;  %s1299_s24 = smov 16  }
  0x65   :  { %86 = dma.hbm_to_vmem [thread:$0]  %s1474_s5, 8192, %s81_s14, [#allocation12], %s1298_s4, %s1298_s4, %s1299_s24  }
  0x66   :  { %1280 = dma.done.wait [#allocation3], 256  }
  0x67   :  { %1281 = vsyncadd [#allocation3], 4294967040 }
  0x68   :  { %1282 = dma.done.wait [#allocation6], 576  }
  0x69   :  { %1283 = vsyncadd [#allocation6], 4294966720 }
  0x6a   :  { %1284 = dma.done.wait [#allocation9], 8192  }
  0x6b   :  { %1285 = vsyncadd [#allocation9], 4294959104 }
  0x6c   :  { %1286 = dma.done.wait [#allocation12], 8192  }
  0x6d   :  { %1287 = vsyncadd [#allocation12], 4294959104  ;;  %v125_v0 = vld [vmem:[#allocation8] sm:$0xff]  ;;  %v126_v1 = vld [vmem:[#allocation8 + $0x8] sm:$0xff]  ;;  %vm225_vm0 = vcmask 130048   ;;  %s1300_s0 = smov [#allocation13]  }
  0x6e   :  { %v127_v2 = vld [vmem:[#allocation8 + $0x10] sm:$0xff]  ;;  %v947_v3 = vpack.c.bf16 %v126_v1, %v125_v0  ;;  %v128_v4 = vld [vmem:[#allocation8 + $0x18] sm:$0xff]  ;;  %v129_v6 = vld [vmem:[#allocation8 + $0x20] sm:$0xff]  ;;  %s758_s16 = sshll.u32 %s1300_s0, 4  ;;  %s759_s16 = int_to_ptr.vmem [resolvable:$true] %s758_s16 }
  0x6f   :  { %v951_v5 = vpack.c.bf16 %v128_v4, %v127_v2  ;;  %v130_v7 = vld [vmem:[#allocation8 + $0x28] sm:$0xff]  ;;  %v131_v9 = vld [vmem:[#allocation8 + $0x30] sm:$0xff]  ;;  %v132_v11 = vld [vmem:[#allocation8 + $0x38] sm:$0xff]  ;;  %s1258_s27 = scalar_lea.vmem %s759_s16, 512  ;;  %p1263_p7 = scmp.lt.s32.totalorder %s759_s16, %s759_s16 }
  0x70   :  { %948 = vmatprep.subr.bf16.mxu0 %v947_v3  ;;  %v955_v8 = vpack.c.bf16 %v130_v7, %v129_v6  ;;  %v1428_v10 = vld [vmem:[#allocation2] sm:$0xff]  ;;  %v773_v12 = vld [vmem:[#allocation5] ss:$0 sm:$0xff]  ;;  %v774_v13 = vld [vmem:[#allocation5 + $0x1] ss:$0 sm:$0xff]  ;;  %v959_v15 = vpack.c.bf16 %v132_v11, %v131_v9  ;;  %p1259_p6 = scmp.ne.s32.totalorder %s759_s16, %s1258_s27  ;;  %p1264_p8 = scmp.lt.s32.totalorder %s1258_s27, %s1258_s27 }
  0x71   :  { %950 = vmatpush3.bf16.msra.mxu0 %v947_v3  ;;  %v114_v14 = vmul.f32 %v773_v12, %v1428_v10  ;;  %v133_v17 = vld [vmem:[#allocation8 + $0x40] sm:$0xff]  ;;  %v134_v18 = vld [vmem:[#allocation8 + $0x48] sm:$0xff]  ;;  %v135_v21 = vld [vmem:[#allocation8 + $0x50] sm:$0xff] }
  0x72   :  { %952 = vmatprep.subr.bf16.mxu0 %v951_v5  ;;  %v963_v20 = vpack.c.bf16 %v134_v18, %v133_v17  ;;  %v136_v22 = vld [vmem:[#allocation8 + $0x58] sm:$0xff]  ;;  %v137_v24 = vld [vmem:[#allocation8 + $0x60] sm:$0xff]  ;;  %v138_v25 = vld [vmem:[#allocation8 + $0x68] sm:$0xff]  ;;  %p1265_p9 = por %p1264_p8, %p1263_p7 }
  0x73   :  { %v121_v16 = vadd.f32 %v774_v13, %v114_v14  ;;  %v967_v23 = vpack.c.bf16 %v136_v22, %v135_v21  ;;  %v1431_v26 = vld [vmem:[#allocation2 + $0x8] sm:$0xff]  ;;  %v971_v27 = vpack.c.bf16 %v138_v25, %v137_v24  ;;  %v223_v34 = vld [vmem:[#allocation7] sm:$0xff]  ;;  %v408_v36 = vld [vmem:[#allocation10 + $0x88] sm:$0xff] }
  0x74   :  { %v139_v28 = vld [vmem:[#allocation8 + $0x70] sm:$0xff]  ;;  %v140_v29 = vld [vmem:[#allocation8 + $0x78] sm:$0xff]  ;;  %v115_v30 = vmul.f32 %v773_v12, %v1431_v26  ;;  %902 = vmatprep.mubr.msk.f32.mxu1 %vm225_vm0, %v223_v34  ;;  %v407_v35 = vld [vmem:[#allocation10 + $0x80] sm:$0xff]  ;;  %p1266_p10 = pnand %p1265_p9, %p1259_p6 }
  0x75   :  { %954 = vmatpush3.bf16.msra.mxu0 %v951_v5  ;;  %v123_v19 = vmax.f32 %v121_v16, 0.0  ;;  %v975_v31 = vpack.c.bf16 %v140_v29, %v139_v28  ;;  %v391_v37 = vld [vmem:[#allocation10] sm:$0xff]  ;;  %v987_v38 = vpack.c.bf16 %v408_v36, %v407_v35  ;;  %v392_v39 = vld [vmem:[#allocation10 + $0x8] sm:$0xff]  ;;  %v409_v40 = vld [vmem:[#allocation10 + $0x90] sm:$0xff] }
  0x76   :  { %956 = vmatprep.subr.bf16.mxu0 %v955_v8  ;;  %v122_v32 = vadd.f32 %v774_v13, %v115_v30  ;;  %v410_v41 = vld [vmem:[#allocation10 + $0x98] sm:$0xff]  ;;  %v989_v42 = vpack.c.bf16 %v392_v39, %v391_v37  ;;  %v393_v44 = vld [vmem:[#allocation10 + $0x10] sm:$0xff]  ;;  %v411_v46 = vld [vmem:[#allocation10 + $0xa0] sm:$0xff] }
  0x77   :  { %895 = vmatprep.mubr.f32.mxu0 %v123_v19  ;;  %v991_v43 = vpack.c.bf16 %v410_v41, %v409_v40  ;;  %v394_v45 = vld [vmem:[#allocation10 + $0x18] sm:$0xff]  ;;  %v412_v47 = vld [vmem:[#allocation10 + $0xa8] sm:$0xff]  ;;  %v395_v50 = vld [vmem:[#allocation10 + $0x20] sm:$0xff] }
  0x78   :  { %v124_v33 = vmax.f32 %v122_v32, 0.0  ;;  %v993_v48 = vpack.c.bf16 %v394_v45, %v393_v44  ;;  %v995_v49 = vpack.c.bf16 %v412_v47, %v411_v46  ;;  %v396_v51 = vld [vmem:[#allocation10 + $0x28] sm:$0xff]  ;;  %v413_v52 = vld [vmem:[#allocation10 + $0xb0] sm:$0xff]  ;;  %v414_v53 = vld [vmem:[#allocation10 + $0xb8] sm:$0xff] }
  0x79   :  { %958 = vmatpush3.bf16.msra.mxu0 %v955_v8  ;;  %v997_v54 = vpack.c.bf16 %v396_v51, %v395_v50  ;;  %v999_v55 = vpack.c.bf16 %v414_v53, %v413_v52  ;;  %v397_v56 = vld [vmem:[#allocation10 + $0x30] sm:$0xff]  ;;  %v398_v57 = vld [vmem:[#allocation10 + $0x38] sm:$0xff]  ;;  %v415_v58 = vld [vmem:[#allocation10 + $0xc0] sm:$0xff] }
  0x7a   :  { %960 = vmatprep.subr.bf16.mxu0 %v959_v15  ;;  %v416_v59 = vld [vmem:[#allocation10 + $0xc8] sm:$0xff]  ;;  %v1001_v60 = vpack.c.bf16 %v398_v57, %v397_v56  ;;  %v399_v62 = vld [vmem:[#allocation10 + $0x40] sm:$0xff]  ;;  %v417_v0 = vld [vmem:[#allocation10 + $0xd0] sm:$0xff] }
  0x7b   :  { %v1003_v61 = vpack.c.bf16 %v416_v59, %v415_v58  ;;  %v400_v63 = vld [vmem:[#allocation10 + $0x48] sm:$0xff]  ;;  %v418_v1 = vld [vmem:[#allocation10 + $0xd8] sm:$0xff]  ;;  %v401_v4 = vld [vmem:[#allocation10 + $0x50] sm:$0xff] }
  0x7c   :  { %v1005_v2 = vpack.c.bf16 %v400_v63, %v399_v62  ;;  %v1007_v3 = vpack.c.bf16 %v418_v1, %v417_v0  ;;  %v402_v5 = vld [vmem:[#allocation10 + $0x58] sm:$0xff]  ;;  %v419_v6 = vld [vmem:[#allocation10 + $0xe0] sm:$0xff]  ;;  %v420_v7 = vld [vmem:[#allocation10 + $0xe8] sm:$0xff] }
  0x7d   :  { %962 = vmatpush3.bf16.msra.mxu0 %v959_v15  ;;  %v1009_v8 = vpack.c.bf16 %v402_v5, %v401_v4  ;;  %v1011_v9 = vpack.c.bf16 %v420_v7, %v419_v6  ;;  %v403_v11 = vld [vmem:[#allocation10 + $0x60] sm:$0xff]  ;;  %v404_v12 = vld [vmem:[#allocation10 + $0x68] sm:$0xff]  ;;  %v421_v13 = vld [vmem:[#allocation10 + $0xf0] sm:$0xff] }
  0x7e   :  { %964 = vmatprep.subr.bf16.mxu0 %v963_v20  ;;  %v422_v14 = vld [vmem:[#allocation10 + $0xf8] sm:$0xff]  ;;  %v1013_v15 = vpack.c.bf16 %v404_v12, %v403_v11  ;;  %v405_v17 = vld [vmem:[#allocation10 + $0x70] sm:$0xff]  ;;  %v224_v29 = vld [vmem:[#allocation7 + $0x8] sm:$0xff] }
  0x7f   :  { %v1015_v16 = vpack.c.bf16 %v422_v14, %v421_v13  ;;  %v406_v18 = vld [vmem:[#allocation10 + $0x78] sm:$0xff]  ;;  %v308_v30 = vld [vmem:[#allocation7 + $0x10] sm:$0xff]  ;;  %v423_v32 = vld [vmem:[#allocation10 + $0x100] sm:$0xff] }
  0x80   :  { %v1017_v19 = vpack.c.bf16 %v406_v18, %v405_v17  ;;  %v597_v35 = vld [vmem:[#allocation11 + $0x8] sm:$0xff]  ;;  %v599_v36 = vld [vmem:[#allocation11 + $0x18] sm:$0xff]  ;;  %v596_v37 = vld [vmem:[#allocation11] sm:$0xff] }
  0x81   :  { %966 = vmatpush3.bf16.msra.mxu0 %v963_v20  ;;  %v775_v20 = vld [vmem:[#allocation5 + $0x2] ss:$0 sm:$0xff]  ;;  %v598_v39 = vld [vmem:[#allocation11 + $0x10] sm:$0xff]  ;;  %v601_v40 = vld [vmem:[#allocation11 + $0x28] sm:$0xff] }
  0x82   :  { %968 = vmatprep.subr.bf16.mxu0 %v967_v23  ;;  %v603_v41 = vld [vmem:[#allocation11 + $0x38] sm:$0xff]  ;;  %v600_v44 = vld [vmem:[#allocation11 + $0x20] sm:$0xff]  ;;  %v602_v45 = vld [vmem:[#allocation11 + $0x30] sm:$0xff] }
  0x83   :  { %v605_v46 = vld [vmem:[#allocation11 + $0x48] sm:$0xff]  ;;  %v1057_v47 = vpack.c.bf16 %v602_v45, %v600_v44  ;;  %v606_v50 = vld [vmem:[#allocation11 + $0x50] sm:$0xff]  ;;  %v611_v52 = vld [vmem:[#allocation11 + $0x78] sm:$0xff] }
  0x84   :  { %v609_v51 = vld [vmem:[#allocation11 + $0x68] sm:$0xff]  ;;  %v610_v56 = vld [vmem:[#allocation11 + $0x70] sm:$0xff]  ;;  %v615_v58 = vld [vmem:[#allocation11 + $0x98] sm:$0xff] }
  0x85   :  { %970 = vmatpush3.bf16.msra.mxu0 %v967_v23  ;;  %v613_v57 = vld [vmem:[#allocation11 + $0x88] sm:$0xff]  ;;  %v614_v62 = vld [vmem:[#allocation11 + $0x90] sm:$0xff]  ;;  %v619_v0 = vld [vmem:[#allocation11 + $0xb8] sm:$0xff] }
  0x86   :  { %972 = vmatprep.subr.bf16.mxu0 %v971_v27  ;;  %v617_v63 = vld [vmem:[#allocation11 + $0xa8] sm:$0xff]  ;;  %v618_v4 = vld [vmem:[#allocation11 + $0xb0] sm:$0xff]  ;;  %v623_v6 = vld [vmem:[#allocation11 + $0xd8] sm:$0xff] }
  0x87   :  { %v621_v5 = vld [vmem:[#allocation11 + $0xc8] sm:$0xff]  ;;  %v622_v11 = vld [vmem:[#allocation11 + $0xd0] sm:$0xff]  ;;  %v426_v14 = vld [vmem:[#allocation10 + $0x118] sm:$0xff] }
  0x88   :  { %v425_v13 = vld [vmem:[#allocation10 + $0x110] sm:$0xff]  ;;  %v427_v18 = vld [vmem:[#allocation10 + $0x120] sm:$0xff]  ;;  %v629_v45 = vld [vmem:[#allocation11 + $0x108] sm:$0xff] }
  0x89   :  { %974 = vmatpush3.bf16.msra.mxu0 %v971_v27 }
  0x8a   :  { %976 = vmatprep.subr.bf16.mxu0 %v975_v31 }
  0x8d   :  { %978 = vmatpush3.bf16.msra.mxu0 %v975_v31  ;;  %v309_v31 = vld [vmem:[#allocation7 + $0x18] sm:$0xff] }
  0x8e   :  { %988 = vmatprep.subr.bf16.mxu0 %v987_v38  ;;  %v1051_v38 = vpack.c.bf16 %v599_v36, %v597_v35  ;;  %v437_v36 = vld [vmem:[#allocation10 + $0x170] sm:$0xff] }
  0x90   :  { %896 = vmatmul.mubr.f32.vlgmr.msra.gmra.mrb[0].mxu0 %v124_v33  ;;  %v424_v33 = vld [vmem:[#allocation10 + $0x108] sm:$0xff] }
  0x91   :  { %990 = vmatpush3.bf16.msra.mxu0 %v989_v42  ;;  %v1444_v34 = vpack.c.bf16 %v424_v33, %v423_v32  ;;  %v1053_v42 = vpack.c.bf16 %v598_v39, %v596_v37  ;;  %v433_v32 = vld [vmem:[#allocation10 + $0x150] sm:$0xff]  ;;  %v434_v33 = vld [vmem:[#allocation10 + $0x158] sm:$0xff]  ;;  %v625_v39 = vld [vmem:[#allocation11 + $0xe8] sm:$0xff] }
  0x92   :  { %992 = vmatprep.subr.bf16.mxu0 %v991_v43  ;;  %v1055_v43 = vpack.c.bf16 %v603_v41, %v601_v40  ;;  %v438_v37 = vld [vmem:[#allocation10 + $0x178] sm:$0xff] }
  0x93   :  { %v627_v40 = vld [vmem:[#allocation11 + $0xf8] sm:$0xff] }
  0x94   :  { %v1079_v41 = vpack.c.bf16 %v627_v40, %v625_v39 }
  0x95   :  { %994 = vmatpush3.bf16.msra.mxu0 %v993_v48 }
  0x96   :  { %996 = vmatprep.subr.bf16.mxu0 %v995_v49  ;;  %v604_v49 = vld [vmem:[#allocation11 + $0x40] sm:$0xff] }
  0x97   :  { %v1061_v53 = vpack.c.bf16 %v606_v50, %v604_v49  ;;  %v633_v50 = vld [vmem:[#allocation11 + $0x128] sm:$0xff] }
  0x99   :  { %998 = vmatpush3.bf16.msra.mxu0 %v997_v54  ;;  %v1063_v54 = vpack.c.bf16 %v611_v52, %v609_v51  ;;  %v635_v51 = vld [vmem:[#allocation11 + $0x138] sm:$0xff]  ;;  %v632_v52 = vld [vmem:[#allocation11 + $0x120] sm:$0xff] }
  0x9a   :  { %1000 = vmatprep.subr.bf16.mxu0 %v999_v55  ;;  %v608_v55 = vld [vmem:[#allocation11 + $0x60] sm:$0xff] }
  0x9b   :  { %v1065_v59 = vpack.c.bf16 %v610_v56, %v608_v55  ;;  %v637_v55 = vld [vmem:[#allocation11 + $0x148] sm:$0xff]  ;;  %v639_v56 = vld [vmem:[#allocation11 + $0x158] sm:$0xff] }
  0x9d   :  { %1002 = vmatpush3.bf16.msra.mxu0 %v1001_v60  ;;  %v1067_v60 = vpack.c.bf16 %v615_v58, %v613_v57  ;;  %v1091_v58 = vpack.c.bf16 %v639_v56, %v637_v55 }
  0x9e   :  { %1004 = vmatprep.subr.bf16.mxu0 %v1003_v61  ;;  %v612_v61 = vld [vmem:[#allocation11 + $0x80] sm:$0xff] }
  0x9f   :  { %v1069_v1 = vpack.c.bf16 %v614_v62, %v612_v61  ;;  %v641_v61 = vld [vmem:[#allocation11 + $0x168] sm:$0xff]  ;;  %v643_v62 = vld [vmem:[#allocation11 + $0x178] sm:$0xff] }
  0xa1   :  { %1006 = vmatpush3.bf16.msra.mxu0 %v1005_v2  ;;  %v1071_v2 = vpack.c.bf16 %v619_v0, %v617_v63  ;;  %v1095_v0 = vpack.c.bf16 %v643_v62, %v641_v61 }
  0xa2   :  { %1008 = vmatprep.subr.bf16.mxu0 %v1007_v3  ;;  %v616_v3 = vld [vmem:[#allocation11 + $0xa0] sm:$0xff] }
  0xa3   :  { %v1073_v7 = vpack.c.bf16 %v618_v4, %v616_v3  ;;  %v645_v3 = vld [vmem:[#allocation11 + $0x188] sm:$0xff]  ;;  %v647_v4 = vld [vmem:[#allocation11 + $0x198] sm:$0xff] }
  0xa5   :  { %1010 = vmatpush3.bf16.msra.mxu0 %v1009_v8  ;;  %v1075_v8 = vpack.c.bf16 %v623_v6, %v621_v5  ;;  %v1099_v6 = vpack.c.bf16 %v647_v4, %v645_v3 }
  0xa6   :  { %1012 = vmatprep.subr.bf16.mxu0 %v1011_v9  ;;  %v620_v9 = vld [vmem:[#allocation11 + $0xc0] sm:$0xff] }
  0xa7   :  { %v1077_v12 = vpack.c.bf16 %v622_v11, %v620_v9  ;;  %v649_v9 = vld [vmem:[#allocation11 + $0x1a8] sm:$0xff]  ;;  %v651_v11 = vld [vmem:[#allocation11 + $0x1b8] sm:$0xff] }
  0xa9   :  { %1014 = vmatpush3.bf16.msra.mxu0 %v1013_v15 }
  0xaa   :  { %1016 = vmatprep.subr.bf16.mxu0 %v1015_v16  ;;  %v1023_v16 = vpack.c.bf16 %v426_v14, %v425_v13  ;;  %v1103_v13 = vpack.c.bf16 %v651_v11, %v649_v9  ;;  %v648_v14 = vld [vmem:[#allocation11 + $0x1a0] sm:$0xff] }
  0xad   :  { %1018 = vmatpush3.bf16.msra.mxu0 %v1017_v19  ;;  %v428_v19 = vld [vmem:[#allocation10 + $0x128] sm:$0xff] }
  0xae   :  { %1020 = vmatprep.subr.bf16.mxu0 %v1444_v34 }
 0x163   :  { %v897_v21 = vpop.f32.mrb[0].mxu0 }
 0x164   :  { %v1435_v22 = vadd.f32 %v897_v21, %v775_v20  ;;  %v212_v23 = vpop.f32.mrb[1].mxu0 }
 0x165   :  { %v213_v24 = vadd.f32 %v775_v20, %v212_v23  ;;  %v1027_v20 = vpack.c.bf16 %v428_v19, %v427_v18  ;;  %v429_v23 = vld [vmem:[#allocation10 + $0x130] sm:$0xff] }
 0x166   :  { %v222_v25 = vmax.f32 %v1435_v22, 0.0  ;;  %v1039_v22 = vpack.c.bf16 %v434_v33, %v433_v32 }
 0x167   :  { %v221_v27 = vmax.f32 %v213_v24, 0.0  ;;  %v430_v24 = vld [vmem:[#allocation10 + $0x138] sm:$0xff] }
 0x169   :  { %v979_v28 = vpack.c.bf16 %v222_v25, %v221_v27  ;;  %508 = vmatprep.mubr.f32.mxu0 %v221_v27 }
 0x16b   :  { %980 = vmatprep.subr.bf16.mxu1 %v979_v28 }
 0x16c   :  { %982 = vmatpush3.bf16.msra.mxu1 %v979_v28 }
 0x16d   :  { %984 = vmatprep.subr.bf16.mxu1 %v979_v28 }
 0x16f   :  { %903 = vmatmul.mubr.msk.f32.vlgmr.msra.gmra.mrb[0].mxu1 %vm225_vm0, %v224_v29  ;;  %v431_v29 = vld [vmem:[#allocation10 + $0x140] sm:$0xff] }
 0x170   :  { %986 = vmatpush3.bf16.msra.mxu1 %v979_v28  ;;  %909 = vmatprep.mubr.msk.f32.mxu1 %vm225_vm0, %v308_v30  ;;  %v1031_v28 = vpack.c.bf16 %v430_v24, %v429_v23  ;;  %v432_v30 = vld [vmem:[#allocation10 + $0x148] sm:$0xff] }
 0x171   :  { %1052 = vmatprep.subr.bf16.mxu1 %v1051_v38  ;;  %v1047_v38 = vpack.c.bf16 %v438_v37, %v437_v36  ;;  %v657_v24 = vld [vmem:[#allocation11 + $0x1e8] sm:$0xff]  ;;  %v780_v36 = vld [vmem:[#allocation5 + $0x3] ss:$0 sm:$0xff] }
 0x173   :  { %910 = vmatmul.mubr.msk.f32.vlgmr.msra.gmra.mrb[2].mxu1 %vm225_vm0, %v309_v31  ;;  %v1035_v31 = vpack.c.bf16 %v432_v30, %v431_v29  ;;  %v656_v29 = vld [vmem:[#allocation11 + $0x1e0] sm:$0xff]  ;;  %v658_v30 = vld [vmem:[#allocation11 + $0x1f0] sm:$0xff] }
 0x174   :  { %736 = vmatprep.mubr.f32.mxu1 %v1428_v10  ;;  %v607_v10 = vld [vmem:[#allocation11 + $0x58] sm:$0xff]  ;;  %1054 = vmatpush1.bf16.msra.mxu1 %v1053_v42  ;;  %v624_v42 = vld [vmem:[#allocation11 + $0xe0] sm:$0xff] }
 0x175   :  { %1056 = vmatprep.subr.bf16.mxu1 %v1055_v43  ;;  %v1059_v48 = vpack.c.bf16 %v607_v10, %v605_v46  ;;  %v626_v43 = vld [vmem:[#allocation11 + $0xf0] sm:$0xff]  ;;  %v631_v46 = vld [vmem:[#allocation11 + $0x118] sm:$0xff] }
 0x176   :  { %v1081_v44 = vpack.c.bf16 %v626_v43, %v624_v42  ;;  %v1083_v10 = vpack.c.bf16 %v631_v46, %v629_v45  ;;  %v662_v45 = vlaneseq }
 0x178   :  { %1058 = vmatpush1.bf16.msra.mxu1 %v1057_v47  ;;  %v628_v47 = vld [vmem:[#allocation11 + $0x100] sm:$0xff]  ;;  %v663_v46 = vshrl.u32 %v662_v45, 7 }
 0x179   :  { %1060 = vmatprep.subr.bf16.mxu1 %v1059_v48  ;;  %v630_v48 = vld [vmem:[#allocation11 + $0x110] sm:$0xff] }
 0x17a   :  { %v1085_v49 = vpack.c.bf16 %v630_v48, %v628_v47  ;;  %v660_v47 = vld [vmem:[%s1475_s6] sm:$0x3]  ;;  %v668_v48 = vsub.s32 1, %v663_v46 }
 0x17c   :  { %1062 = vmatpush1.bf16.msra.mxu1 %v1061_v53  ;;  %v1087_v53 = vpack.c.bf16 %v635_v51, %v633_v50  ;;  %v669_v50 = vrot.slane %v660_v47, %v668_v48 }
 0x17d   :  { %1064 = vmatprep.subr.bf16.mxu1 %v1063_v54  ;;  %v634_v54 = vld [vmem:[#allocation11 + $0x130] sm:$0xff] }
 0x17e   :  { %v1089_v57 = vpack.c.bf16 %v634_v54, %v632_v52 }
 0x180   :  { %1066 = vmatpush1.bf16.msra.mxu1 %v1065_v59  ;;  %v636_v59 = vld [vmem:[#allocation11 + $0x140] sm:$0xff] }
 0x181   :  { %1068 = vmatprep.subr.bf16.mxu1 %v1067_v60  ;;  %v638_v60 = vld [vmem:[#allocation11 + $0x150] sm:$0xff] }
 0x182   :  { %v1093_v63 = vpack.c.bf16 %v638_v60, %v636_v59 }
 0x184   :  { %1070 = vmatpush1.bf16.msra.mxu1 %v1069_v1  ;;  %v640_v1 = vld [vmem:[#allocation11 + $0x160] sm:$0xff] }
 0x185   :  { %1072 = vmatprep.subr.bf16.mxu1 %v1071_v2  ;;  %v642_v2 = vld [vmem:[#allocation11 + $0x170] sm:$0xff] }
 0x186   :  { %v1097_v5 = vpack.c.bf16 %v642_v2, %v640_v1 }
 0x188   :  { %1074 = vmatpush1.bf16.msra.mxu1 %v1073_v7  ;;  %v644_v7 = vld [vmem:[#allocation11 + $0x180] sm:$0xff] }
 0x189   :  { %1076 = vmatprep.subr.bf16.mxu1 %v1075_v8  ;;  %v646_v8 = vld [vmem:[#allocation11 + $0x190] sm:$0xff] }
 0x18c   :  { %1078 = vmatpush1.bf16.msra.mxu1 %v1077_v12  ;;  %v1101_v12 = vpack.c.bf16 %v646_v8, %v644_v7 }
 0x18d   :  { %1080 = vmatprep.subr.bf16.mxu1 %v1079_v41 }
 0x190   :  { %1082 = vmatpush1.bf16.msra.mxu1 %v1081_v44 }
 0x191   :  { %1084 = vmatprep.subr.bf16.mxu1 %v1083_v10  ;;  %v664_v10 = vsub.s32 0, %v663_v46 }
 0x194   :  { %1086 = vmatpush1.bf16.msra.mxu1 %v1085_v49  ;;  %v665_v49 = vrot.slane %v660_v47, %v664_v10 }
 0x195   :  { %1088 = vmatprep.subr.bf16.mxu1 %v1087_v53 }
 0x198   :  { %1090 = vmatpush1.bf16.msra.mxu1 %v1089_v57 }
 0x199   :  { %1092 = vmatprep.subr.bf16.mxu1 %v1091_v58 }
 0x19c   :  { %1094 = vmatpush1.bf16.msra.mxu1 %v1093_v63 }
 0x19d   :  { %1096 = vmatprep.subr.bf16.mxu1 %v1095_v0 }
 0x1a0   :  { %1098 = vmatpush1.bf16.msra.mxu1 %v1097_v5 }
 0x1a1   :  { %1100 = vmatprep.subr.bf16.mxu1 %v1099_v6 }
 0x1a4   :  { %1102 = vmatpush1.bf16.msra.mxu1 %v1101_v12 }
 0x1a5   :  { %1104 = vmatprep.subr.bf16.mxu1 %v1103_v13 }
 0x242   :  { %v904_v15 = vpop.f32.mrb[0].mxu1 }
 0x243   :  { %v298_v17 = vpop.f32.mrb[1].mxu1 }
 0x244   :  { %509 = vmatmul.mubr.f32.vlgmr.msra.gmra.mrb[2].mxu0 %v298_v17  ;;  %v655_v17 = vld [vmem:[#allocation11 + $0x1d8] sm:$0xff] }
 0x245   :  { %1022 = vmatpush3.bf16.msra.mxu0 %v1444_v34  ;;  %513 = vmatprep.mubr.f32.mxu0 %v222_v25  ;;  %v435_v25 = vld [vmem:[#allocation10 + $0x160] sm:$0xff]  ;;  %v436_v34 = vld [vmem:[#allocation10 + $0x168] sm:$0xff] }
 0x246   :  { %1024 = vmatprep.subr.bf16.mxu0 %v1023_v16  ;;  %v911_v21 = vpop.f32.mrb[2].mxu1  ;;  %v1043_v35 = vpack.c.bf16 %v436_v34, %v435_v25 }
 0x247   :  { %v382_v27 = vpop.f32.mrb[3].mxu1 }
 0x248   :  { %514 = vmatmul.mubr.f32.gmra.mrb[4].mxu0 %v904_v15  ;;  %v650_v15 = vld [vmem:[#allocation11 + $0x1b0] sm:$0xff] }
 0x249   :  { %1026 = vmatpush3.bf16.msra.mxu0 %v1023_v16  ;;  %944 = vmatprep.mubr.f32.mxu0 %v382_v27  ;;  %v653_v16 = vld [vmem:[#allocation11 + $0x1c8] sm:$0xff]  ;;  %v1105_v18 = vpack.c.bf16 %v650_v15, %v648_v14  ;;  %v659_v27 = vld [vmem:[#allocation11 + $0x1f8] sm:$0xff] }
 0x24a   :  { %1028 = vmatprep.subr.bf16.mxu0 %v1027_v20  ;;  %v1107_v19 = vpack.c.bf16 %v655_v17, %v653_v16 }
 0x24b   :  { %1106 = vmatpush1.bf16.msra.mxu1 %v1105_v18 }
 0x24c   :  { %1108 = vmatprep.subr.bf16.mxu1 %v1107_v19 }
 0x24d   :  { %1030 = vmatpush3.bf16.msra.mxu0 %v1027_v20  ;;  %v652_v20 = vld [vmem:[#allocation11 + $0x1c0] sm:$0xff] }
 0x24e   :  { %1032 = vmatprep.subr.bf16.mxu0 %v1031_v28 }
 0x251   :  { %1034 = vmatpush3.bf16.msra.mxu0 %v1031_v28  ;;  %v1111_v28 = vpack.c.bf16 %v659_v27, %v657_v24 }
 0x252   :  { %1036 = vmatprep.subr.bf16.mxu0 %v1035_v31 }
 0x255   :  { %1038 = vmatpush3.bf16.msra.mxu0 %v1035_v31  ;;  %v1113_v31 = vpack.c.bf16 %v658_v30, %v656_v29 }
 0x256   :  { %1040 = vmatprep.subr.bf16.mxu0 %v1039_v22 }
 0x259   :  { %1042 = vmatpush3.bf16.msra.mxu0 %v1039_v22 }
 0x25a   :  { %1044 = vmatprep.subr.bf16.mxu0 %v1043_v35 }
 0x25d   :  { %1046 = vmatpush3.bf16.msra.mxu0 %v1043_v35 }
 0x25e   :  { %1048 = vmatprep.subr.bf16.mxu0 %v1047_v38 }
 0x261   :  { %1050 = vmatpush3.bf16.msra.mxu0 %v1047_v38 }
 0x264   :  { %945 = vmatmul.mubr.f32.vlgmr.msra.gmra.mrb[6].mxu0 %v911_v21  ;;  %v654_v21 = vld [vmem:[#allocation11 + $0x1d0] sm:$0xff] }
 0x265   :  { %v1109_v23 = vpack.c.bf16 %v654_v21, %v652_v20 }
 0x267   :  { %1110 = vmatpush1.bf16.msra.mxu1 %v1109_v23 }
 0x268   :  { %1112 = vmatprep.subr.bf16.mxu1 %v1111_v28 }
 0x26b   :  { %1114 = vmatpush1.bf16.msra.mxu1 %v1113_v31 }
 0x317   :  { %v839_v32 = vpop.f32.mrb[2].mxu0 }
 0x318   :  { %v840_v33 = vpop.f32.mrb[3].mxu0 }
 0x319   :  { %v841_v22 = vadd.f32 %v840_v33, %v839_v32 }
 0x31b   :  { %v842_v25 = vpop.f32.mrb[4].mxu0  ;;  %v511_v39 = vadd.f32 %v841_v22, %v780_v36 }
 0x31c   :  { %v843_v34 = vpop.f32.mrb[5].mxu0 }
 0x31d   :  { %v844_v35 = vadd.f32 %v843_v34, %v842_v25 }
 0x31f   :  { %v516_v37 = vadd.f32 %v844_v35, %v780_v36 }
 0x337   :  { %v946_v38 = vpop.f32.mrb[6].mxu0 }
 0x338   :  { %v591_v40 = vadd.f32 %v946_v38, %v516_v37  ;;  %v585_v41 = vpop.f32.mrb[7].mxu0 }
 0x339   :  { %v586_v42 = vadd.f32 %v585_v41, %v511_v39 }
 0x33a   :  { %v595_v44 = vmax.f32 %v591_v40, 0.0 }
 0x33b   :  { %v594_v43 = vmax.f32 %v586_v42, 0.0 }
 0x33d   :  { %737 = vmatmul.mubr.f32.vlgmr.msra.gmra.mrb[4].mxu1 %v594_v43 }
 0x33e   :  { %742 = vmatprep.mubr.f32.mxu1 %v1431_v26 }
 0x341   :  { %743 = vmatmul.mubr.f32.gmra.mrb[6].mxu1 %v595_v44 }
 0x410   :  { %v738_v51 = vpop.f32.mrb[4].mxu1 }
 0x411   :  { %v739_v52 = vadd.f32 %v738_v51, %v665_v49  ;;  %v740_v53 = vpop.f32.mrb[5].mxu1 }
 0x412   :  { %v741_v54 = vadd.f32 %v740_v53, %v669_v50 }
 0x413   :  { %749 = vst [vmem:[#allocation13] sm:$0xff] %v739_v52 }
 0x414   :  { %750 = vst [vmem:[#allocation13 + $0x8] sm:$0xff] %v741_v54  ;;  %v744_v26 = vpop.f32.mrb[6].mxu1 }
 0x415   :  { %v745_v55 = vadd.f32 %v744_v26, %v665_v49  ;;  %v746_v56 = vpop.f32.mrb[7].mxu1 }
 0x416   :  { %v747_v57 = vadd.f32 %v746_v56, %v669_v50 }
 0x417   :  { %751 = vst [vmem:[#allocation13 + $0x10] sm:$0xff] %v745_v55 }
 0x418   :  { %752 = vst [vmem:[#allocation13 + $0x18] sm:$0xff] %v747_v57 }
 0x419   :  { %1269 = shalt.err (!%p1266_p10)
}
 0x41a   :  { %s1270_s29 = scalar_lea.hbm %s1476_s7, 512 }
 0x41b   :  { %p1271_p11 = scmp.ne.s32.totalorder %s1476_s7, %s1270_s29  ;;  %p1274_p12 = scmp.lt.u32.totalorder %s1270_s29, %s1476_s7 }
 0x41d   :  { %p1276_p13 = pnand %p1274_p12, %p1271_p11 }
 0x41f   :  { %1279 = shalt.err (!%p1276_p13)
}
 0x420   :  { %764 = dma.vmem_to_hbm [thread:$0]  %s759_s16, 512, %s1476_s7, [#allocation4], %s1298_s4, %s1298_s4, %s1299_s24  }
 0x421   :  { %1288 = dma.done.wait [#allocation4], 512  }
 0x422   :  { %1289 = vsyncadd [#allocation4], 4294966784 }
 0x423   :  { %768 = vsyncpa [#allocation3], 1 }
 0x424   :  { %769 = vsyncpa [#allocation6], 1 }
 0x425   :  { %770 = vsyncpa [#allocation9], 1 }
 0x426   :  { %771 = vsyncpa [#allocation12], 1 }
 0x427   :  { %772 = vsyncpa [#allocation4], 1 }

</bundles_post_ra>
